<compile_context>
chip_gen: v7x
topology: tpu7x:2x2x1
jax: 0.10.0
libtpu: 0.0.40
codegen_flags: <defaults>
</compile_context>

<pallas_src>
import functools

import numpy as np
import jax
import jax.numpy as jnp
from jax.experimental import pallas as pl
from jax.experimental.pallas import tpu as pltpu


# ----------------------------------------------------------------------------
# Mask construction (module __init__ glue; plain numpy, done once)
# ----------------------------------------------------------------------------
def preselect_center_mask(shape, acceleration=4, line_constrained=False):
    """Binary (1, H, W) float32 mask selecting the centered 1/acceleration region."""
    H, W = shape
    m = np.zeros((1, H, W), dtype=np.float32)
    if line_constrained:
        num = int(W / acceleration)
        ws = (W - num) // 2
        m[:, :, ws:ws + num] = 1.0
    else:
        ratio = (1.0 / acceleration) ** 0.5
        sh, sw = int(H * ratio), int(W * ratio)
        hs, ws = (H - sh) // 2, (W - sw) // 2
        m[:, hs:hs + sh, ws:ws + sw] = 1.0
    return m


# ----------------------------------------------------------------------------
# Per-generation / per-dtype tuning helpers
# ----------------------------------------------------------------------------
def _sublane(dtype):
    # sublane packing: 8 rows for 32-bit, 16 for 16-bit, 32 for 8-bit dtypes
    return max(8, 32 // jnp.dtype(dtype).itemsize)


def _device_tuning():
    """(max_tile_bytes, vmem_limit_bytes) chosen per TPU generation."""
    kind = ""
    try:
        kind = (jax.devices()[0].device_kind or "").lower()
    except Exception:
        pass
    if "v5 lite" in kind or "v5e" in kind or "v5lite" in kind:
        # 2x(in)+2x(out) double-buffered 3 MiB tiles stay under the 16 MiB
        # default scoped-VMEM limit.
        return 3 << 20, None
    if "v6" in kind or "v7" in kind:
        # Bigger tiles amortize the ~0.35us/step overhead at 1.4-3.2 TB/s HBM;
        # explicit limit stays under v7x's 64 MiB physical VMEM.
        return 8 << 20, 40 << 20
    if "v4" in kind or "v5p" in kind or "v5" in kind:
        return 8 << 20, 48 << 20
    return 3 << 20, None  # unknown backend: conservative


def _choose_block_rows_2d(n_rows, row_bytes, sub, max_tile_bytes,
                          split_min_bytes=512 << 10):
    """Rows per grid step for the flattened (n_rows, H*W) layout."""
    cap = max(1, max_tile_bytes // max(row_bytes, 1))
    if cap < n_rows:
        t = max(sub, (cap // sub) * sub)
        return min(t, n_rows)
    # Everything fits in one tile: prefer >=2 steps (v7x megacore) when each
    # half-tile still amortizes per-step overhead.
    if n_rows > 1:
        half = (n_rows + 1) // 2
        half = ((half + sub - 1) // sub) * sub
        if half < n_rows and half * row_bytes >= split_min_bytes:
            return half
    return n_rows


def _choose_tiles_3d(n_rows, H, W, itemsize, sub, max_tile_bytes,
                     target_bands=8, split_min_bytes=512 << 10):
    """(block_rows, band_h) for the banded (n_rows, H, W) layout."""
    row_bytes = W * itemsize
    band_h = max(sub, (H // target_bands // sub) * sub)       # ~H/8, sublane aligned
    max_band = max(sub, (max_tile_bytes // max(row_bytes, 1) // sub) * sub)
    band_h = min(band_h, max_band, ((H + sub - 1) // sub) * sub)
    band_bytes = band_h * row_bytes
    cap = max(1, max_tile_bytes // band_bytes)
    if cap < n_rows:
        block_rows = cap
    else:
        block_rows = n_rows
        if n_rows > 1:
            half = (n_rows + 1) // 2
            if half * band_bytes >= split_min_bytes:           # v7x megacore split
                block_rows = half
    return block_rows, band_h


# ----------------------------------------------------------------------------
# Kernels
# ----------------------------------------------------------------------------
def _mask_mul_2d_kernel(mask_ref, x_ref, o_ref):
    # mask_ref: (1, HW) broadcast over rows; x_ref/o_ref: (T, HW)
    o_ref[...] = x_ref[...] * mask_ref[...]


def _mask_mul_3d_kernel(band_lo, band_hi, mask_ref, x_ref, o_ref):
    # mask_ref: (band_h, W); x_ref/o_ref: (T, band_h, W)
    j = pl.program_id(1)
    in_band = jnp.logical_and(j >= band_lo, j <= band_hi)

    @pl.when(in_band)
    def _():
        o_ref[...] = x_ref[...] * mask_ref[...]

    @pl.when(jnp.logical_not(in_band))
    def _():
        # Statically-zero band: never touch the input, just zero-fill the output.
        o_ref[...] = jnp.zeros_like(o_ref)


# ----------------------------------------------------------------------------
# pallas_call wrappers
# ----------------------------------------------------------------------------
@functools.partial(jax.jit,
                   static_argnames=("block_rows", "vmem_limit_bytes", "donate"))
def _apply_mask_pallas_2d(mask_flat, x, *, block_rows, vmem_limit_bytes, donate):
    n_rows, hw = x.shape
    cp = {}
    if vmem_limit_bytes is not None:
        cp["vmem_limit_bytes"] = vmem_limit_bytes
    return pl.pallas_call(
        _mask_mul_2d_kernel,
        out_shape=jax.ShapeDtypeStruct((n_rows, hw), x.dtype),
        grid=(pl.cdiv(n_rows, block_rows),),
        in_specs=[
            pl.BlockSpec((1, hw), lambda i: (0, 0)),            # mask (reused)
            pl.BlockSpec((block_rows, hw), lambda i: (i, 0)),   # kspace slab
        ],
        out_specs=pl.BlockSpec((block_rows, hw), lambda i: (i, 0)),
        compiler_params=pltpu.CompilerParams(
            dimension_semantics=("parallel",), **cp),
        input_output_aliases=({1: 0} if donate else {}),
    )(mask_flat, x)


@functools.partial(jax.jit,
                   static_argnames=("block_rows", "band_h", "band_lo", "band_hi",
                                    "vmem_limit_bytes", "donate"))
def _apply_mask_pallas_3d(mask_hw, x, *, block_rows, band_h, band_lo, band_hi,
                          vmem_limit_bytes, donate):
    n_rows, H, W = x.shape
    n_bands = pl.cdiv(H, band_h)
    row_steps = pl.cdiv(n_rows, block_rows)

    def x_index(i, j):
        # Zero bands are clamped onto the nearest nonzero band.  The kernel only
        # reads x inside [band_lo, band_hi]; consecutive identical block indices
        # let Pallas elide the HBM->VMEM copy for the zero region entirely.
        jc = jnp.minimum(jnp.maximum(j, band_lo), band_hi)
        return (i, jc, 0)

    cp = {}
    if vmem_limit_bytes is not None:
        cp["vmem_limit_bytes"] = vmem_limit_bytes

    kernel = functools.partial(_mask_mul_3d_kernel, band_lo, band_hi)
    return pl.pallas_call(
        kernel,
        out_shape=jax.ShapeDtypeStruct((n_rows, H, W), x.dtype),
        grid=(row_steps, n_bands),
        in_specs=[
            pl.BlockSpec((band_h, W), lambda i, j: (j, 0)),              # mask band
            pl.BlockSpec((block_rows, band_h, W), x_index),              # kspace slab
        ],
        out_specs=pl.BlockSpec((block_rows, band_h, W), lambda i, j: (i, j, 0)),
        compiler_params=pltpu.CompilerParams(
            # rows axis sharded across TensorCores (balanced); band axis runs
            # sequentially per slab so zero-band copy elision kicks in.
            dimension_semantics=("parallel", "arbitrary"), **cp),
        input_output_aliases=({1: 0} if donate else {}),
    )(mask_hw, x)


# ----------------------------------------------------------------------------
# Module-equivalent wrapper
# ----------------------------------------------------------------------------
class CenterSampler:
    def __init__(self, shape=(320, 320), subsampling_dim=(-2, -1), acceleration=4,
                 line_constrained=False, xla_fallback_bytes=1 << 20,
                 donate_kspace=False):
        self.shape = tuple(shape)
        self.subsampling_dim = subsampling_dim
        self.acceleration = acceleration
        self.line_constrained = line_constrained
        self.xla_fallback_bytes = int(xla_fallback_bytes)
        self.donate_kspace = bool(donate_kspace)

        self._mask_np = preselect_center_mask(
            self.shape, acceleration=acceleration, line_constrained=line_constrained)
        self.mask_binarized = jnp.asarray(self._mask_np)          # (1, H, W) float32
        self.mask_binarized_vis = self.mask_binarized[0]

        # Nonzero-row extent of the static mask (drives the zero-band DMA skip).
        rows = np.flatnonzero(self._mask_np.any(axis=(0, 2)))
        self._row_lo = int(rows[0]) if rows.size else 0
        self._row_hi = int(rows[-1]) + 1 if rows.size else 0

        self._max_tile_bytes, self._vmem_limit = _device_tuning()
        self._mask_cache = {}   # (kind, dtype_name, col_rep) -> device mask

    def _mask_for(self, kind, dtype, col_rep):
        key = (kind, jnp.dtype(dtype).name, col_rep)
        if key not in self._mask_cache:
            m = self._mask_np[0]                                   # (H, W) numpy
            if col_rep > 1:
                m = np.repeat(m, col_rep, axis=-1)                 # interleave for real/imag
            if kind == "2d":
                m = m.reshape(1, -1)
            self._mask_cache[key] = jnp.asarray(m, dtype=dtype)
        return self._mask_cache[key]

    def __call__(self, kspace):
        squeeze_chan = False
        if kspace.ndim == 3:                                       # (B, H, W)
            kspace = kspace[:, None]
            squeeze_chan = True
        B, C, H, W = kspace.shape
        assert (H, W) == self.shape, "kspace spatial dims must match sampler shape"

        is_complex = jnp.issubdtype(kspace.dtype, jnp.complexfloating)
        if is_complex:
            real_dt = jnp.float32 if kspace.dtype == jnp.dtype(jnp.complex64) else jnp.float64
            x = jnp.stack([kspace.real, kspace.imag], axis=-1).reshape(B, C, H, W * 2)
            col_rep, comp_dtype = 2, real_dt
        else:
            x, col_rep, comp_dtype = kspace, 1, kspace.dtype

        n_rows = B * C
        W_eff = W * col_rep
        itemsize = jnp.dtype(comp_dtype).itemsize
        total_bytes = n_rows * H * W_eff * itemsize

        if total_bytes < self.xla_fallback_bytes or self._row_hi <= self._row_lo:
            # Tiny input (or degenerate empty mask): plain XLA broadcast multiply.
            out = (self.mask_binarized[:, None, :, :] * kspace).astype(kspace.dtype)
            return (out[:, 0] if squeeze_chan else out), self.mask_binarized

        sub = _sublane(comp_dtype)
        if W_eff >= 128:
            # 3-D banded path with zero-row DMA skip.
            block_rows, band_h = _choose_tiles_3d(
                n_rows, H, W_eff, itemsize, sub, self._max_tile_bytes)
            band_lo = self._row_lo // band_h
            band_hi = (self._row_hi - 1) // band_h
            mask_hw = self._mask_for("3d", comp_dtype, col_rep)    # (H, W_eff)
            out = _apply_mask_pallas_3d(
                mask_hw, x.reshape(n_rows, H, W_eff),
                block_rows=block_rows, band_h=band_h,
                band_lo=band_lo, band_hi=band_hi,
                vmem_limit_bytes=self._vmem_limit, donate=self.donate_kspace)
        else:
            # Small W: flatten to a lane-dense (n_rows, H*W_eff) layout.
            hw = H * W_eff
            block_rows = _choose_block_rows_2d(
                n_rows, hw * itemsize, sub, self._max_tile_bytes)
            mask_flat = self._mask_for("2d", comp_dtype, col_rep)  # (1, H*W_eff)
            out = _apply_mask_pallas_2d(
                mask_flat, x.reshape(n_rows, hw),
                block_rows=block_rows,
                vmem_limit_bytes=self._vmem_limit, donate=self.donate_kspace)

        out = out.reshape(B, C, H, W_eff)
        if is_complex:
            out = out.reshape(B, C, H, W, 2)
            out = jax.lax.complex(out[..., 0], out[..., 1]).astype(kspace.dtype)
        if squeeze_chan:
            out = out[:, 0]
        # forward returns (masked kspace, (1, H, W) mask) — matches PyTorch module.
        return out, self.mask_binarized


# ----------------------------------------------------------------------------
# Demo / self-check
# ----------------------------------------------------------------------------
if __name__ == "__main__":
    key = jax.random.PRNGKey(0)
    k1, k2, k3, k4 = jax.random.split(key, 4)

    def ref_forward(sampler, ksp):
        return (sampler.mask_binarized[:, None, :, :] * ksp).astype(ksp.dtype)

    # 1) Tiny f32 input -> flattened lane-dense 2-D Pallas path (fallback disabled).
    B, C, H, W = 2, 4, 16, 16
    ks = jax.random.normal(k1, (B, C, H, W), dtype=jnp.float32)
    s = CenterSampler(shape=(H, W), acceleration=4, xla_fallback_bytes=0)
    out, mask = s(ks)
    out, mask = jax.block_until_ready(out), jax.block_until_ready(mask)
    assert out.shape == (B, C, H, W) and mask.shape == (1, H, W)
    assert jnp.allclose(out, ref_forward(s, ks), atol=0, rtol=0)

    # 2) W >= 128 -> 3-D banded path with zero-row DMA skip (ragged H band).
    B, C, H, W = 2, 3, 152, 128
    ks = jax.random.normal(k2, (B, C, H, W), dtype=jnp.float32)
    s = CenterSampler(shape=(H, W), acceleration=4, xla_fallback_bytes=0)
    out, mask = s(ks)
    out = jax.block_until_ready(out)
    assert out.shape == (B, C, H, W)
    assert jnp.allclose(out, ref_forward(s, ks), atol=0, rtol=0)

    # 3) complex64 kspace (real/imag folded into the lane axis around the kernel).
    B, C, H, W = 1, 2, 16, 16
    ks = (jax.random.normal(k3, (B, C, H, W), dtype=jnp.float32)
          + 1j * jax.random.normal(k4, (B, C, H, W), dtype=jnp.float32)).astype(jnp.complex64)
    s = CenterSampler(shape=(H, W), acceleration=4, xla_fallback_bytes=0)
    out, mask = s(ks)
    out = jax.block_until_ready(out)
    assert out.dtype == jnp.complex64
    assert jnp.allclose(out, ref_forward(s, ks), atol=0, rtol=0)

    # 4) Default tiny-input XLA fallback path.
    B, C, H, W = 2, 4, 16, 16
    ks = jax.random.normal(k1, (B, C, H, W), dtype=jnp.float32)
    s = CenterSampler(shape=(H, W), acceleration=4)
    out, mask = s(ks)
    out = jax.block_until_ready(out)
    assert jnp.allclose(out, ref_forward(s, ks), atol=0, rtol=0)

    print("KERNEL_OK")
</pallas_src>

<mosaic_0001>
module attributes {stable_mosaic.version = 11 : i64} {
  func.func @_mask_mul_2d_kernel(%arg0: i32, %arg1: memref<1x256xf32, #tpu.memory_space<vmem>>, %arg2: memref<8x256xf32, #tpu.memory_space<vmem>>, %arg3: memref<8x256xf32, #tpu.memory_space<vmem>>) attributes {dimension_semantics = [#tpu.dimension_semantics<parallel>], iteration_bounds = array<i64: 1>, scalar_prefetch = 0 : i64, scratch_operands = 0 : i64, tpu.core_type = #tpu.core_type<tc>, window_params = [{pipeline_mode = #tpu.pipeline_mode<synchronous>, transform_indices = @transform_0, window_bounds = array<i64: 1, 256>}, {transform_indices = @transform_1, window_bounds = array<i64: 8, 256>}, {transform_indices = @transform_2, window_bounds = array<i64: 8, 256>}]} {
    %c0 = arith.constant 0 : index
    %c0_0 = arith.constant 0 : index
    %0 = vector.load %arg2[%c0, %c0_0] : memref<8x256xf32, #tpu.memory_space<vmem>>, vector<8x256xf32>
    %c0_1 = arith.constant 0 : index
    %c0_2 = arith.constant 0 : index
    %1 = vector.load %arg1[%c0_1, %c0_2] : memref<1x256xf32, #tpu.memory_space<vmem>>, vector<1x256xf32>
    %2 = vector.broadcast %1 : vector<1x256xf32> to vector<8x256xf32>
    %3 = arith.mulf %0, %2 : vector<8x256xf32>
    %c0_3 = arith.constant 0 : index
    %c0_4 = arith.constant 0 : index
    %4 = vector.load %arg3[%c0_3, %c0_4] : memref<8x256xf32, #tpu.memory_space<vmem>>, vector<8x256xf32>
    tpu.vector_store %arg3[%c0_3, %c0_4], %3 {strides = array<i32>} : memref<8x256xf32, #tpu.memory_space<vmem>>, vector<8x256xf32>,
    return
  }
  func.func @transform_0(%arg0: i32) -> (i32, i32) {
    %c0_i32 = arith.constant 0 : i32
    %c0_i32_0 = arith.constant 0 : i32
    %c0_i32_1 = arith.constant 0 : i32
    return %c0_i32, %c0_i32_0 : i32, i32
  }
  func.func @transform_1(%arg0: i32) -> (i32, i32) {
    %c0_i32 = arith.constant 0 : i32
    %c0_i32_0 = arith.constant 0 : i32
    return %arg0, %c0_i32 : i32, i32
  }
  func.func @transform_2(%arg0: i32) -> (i32, i32) {
    %c0_i32 = arith.constant 0 : i32
    %c0_i32_0 = arith.constant 0 : i32
    return %arg0, %c0_i32 : i32, i32
  }
}

</mosaic_0001>

<bundles_post_ra>
// kernel: _apply_mask_pallas_2d.1
= control target key start
LH: loop header
LB: loop body
LE: loop exit
PB: predicated region body
PF: predicated region fallthrough
CT: control target
= control target key end

     0   :  { %7 = vsyncpa [#allocation3], 0  ;;  %s199_s0 = inlined_call_operand.hbm [shape: f32[1,256], index: 0, kind: input, shape index: {}]   ;;  %s200_s1 = inlined_call_operand.hbm [shape: f32[8,256], index: 1, kind: input, shape index: {}]   ;;  %s201_s2 = inlined_call_operand.hbm [shape: f32[8,256], index: 2, kind: output, shape index: {}]  }
   0x1   :  { %8 = vsyncpa [#allocation6], 0 }
   0x2   :  { %9 = vsyncpa [#allocation4], 0  ;;  %s145_s9 = smov [#allocation2]   ;;  %s146_s11 = smov [#allocation5]  }
   0x3   :  { %s16_s10 = sshll.u32 %s145_s9, 4  ;;  %s26_s12 = sshll.u32 %s146_s11, 4  ;;  %s17_s10 = int_to_ptr.vmem [resolvable:$true] %s16_s10  ;;  %s27_s12 = int_to_ptr.vmem [resolvable:$true] %s26_s12 }
   0x4   :  { %s73_s15 = scalar_lea.hbm %s199_s0, 32 }
   0x5   :  { %p74_p0 = scmp.ne.s32.totalorder %s199_s0, %s73_s15  ;;  %p77_p1 = scmp.lt.u32.totalorder %s73_s15, %s199_s0 }
   0x7   :  { %p79_p2 = pnand %p77_p1, %p74_p0 }
   0x9   :  { %82 = shalt.err (!%p79_p2)
}
   0xa   :  { %s83_s20 = scalar_lea.vmem %s17_s10, 32  ;;  %p88_p4 = scmp.lt.s32.totalorder %s17_s10, %s17_s10 }
   0xb   :  { %p84_p3 = scmp.ne.s32.totalorder %s17_s10, %s83_s20  ;;  %p89_p5 = scmp.lt.s32.totalorder %s83_s20, %s83_s20 }
   0xd   :  { %p90_p6 = por %p89_p5, %p88_p4 }
   0xf   :  { %p91_p7 = pnand %p90_p6, %p84_p3 }
  0x11   :  { %94 = shalt.err (!%p91_p7)
}
  0x12   :  { %19 = dma.hbm_to_vmem [thread:$0]  %s199_s0, 32, %s17_s10, [#allocation3]  }
  0x13   :  { %s95_s25 = scalar_lea.hbm %s200_s1, 256 }
  0x14   :  { %p96_p8 = scmp.ne.s32.totalorder %s200_s1, %s95_s25  ;;  %p99_p9 = scmp.lt.u32.totalorder %s95_s25, %s200_s1 }
  0x16   :  { %p101_p10 = pnand %p99_p9, %p96_p8 }
  0x18   :  { %104 = shalt.err (!%p101_p10)
}
  0x19   :  { %s105_s30 = scalar_lea.vmem %s27_s12, 256  ;;  %p110_p12 = scmp.lt.s32.totalorder %s27_s12, %s27_s12 }
  0x1a   :  { %p106_p11 = scmp.ne.s32.totalorder %s27_s12, %s105_s30  ;;  %p111_p13 = scmp.lt.s32.totalorder %s105_s30, %s105_s30 }
  0x1c   :  { %p112_p0 = por %p111_p13, %p110_p12 }
  0x1e   :  { %p113_p1 = pnand %p112_p0, %p106_p11 }
  0x20   :  { %116 = shalt.err (!%p113_p1)
}
  0x21   :  { %29 = dma.hbm_to_vmem [thread:$0]  %s200_s1, 256, %s27_s12, [#allocation6]  }
  0x22   :  { %139 = dma.done.wait [#allocation3], 32  }
  0x23   :  { %140 = vsyncadd [#allocation3], 4294967264 }
  0x24   :  { %141 = dma.done.wait [#allocation6], 256  }
  0x25   :  { %142 = vsyncadd [#allocation6], 4294967040  ;;  %v40_v0 = vlaneseq  ;;  %v36_v4 = vld [vmem:[#allocation5] sm:$0xff]  ;;  %v38_v5 = vld [vmem:[#allocation2] sm:$0x3]  ;;  %s147_s4 = smov [#allocation7]  }
  0x26   :  { %v37_v6 = vld [vmem:[#allocation5 + $0x8] sm:$0xff]  ;;  %s60_s5 = sshll.u32 %s147_s4, 4  ;;  %s61_s5 = int_to_ptr.vmem [resolvable:$true] %s60_s5 }
  0x27   :  { %v41_v1 = vshrl.u32 %v40_v0, 7  ;;  %s117_s1 = scalar_lea.vmem %s61_s5, 256  ;;  %p122_p3 = scmp.lt.s32.totalorder %s61_s5, %s61_s5 }
  0x28   :  { %p118_p2 = scmp.ne.s32.totalorder %s61_s5, %s117_s1  ;;  %p123_p4 = scmp.lt.s32.totalorder %s117_s1, %s117_s1 }
  0x29   :  { %v42_v2 = vsub.s32 0, %v41_v1  ;;  %v46_v3 = vsub.s32 1, %v41_v1 }
  0x2a   :  { %p124_p5 = por %p123_p4, %p122_p3 }
  0x2b   :  { %v43_v7 = vrot.slane %v38_v5, %v42_v2  ;;  %v47_v8 = vrot.slane %v38_v5, %v46_v3 }
  0x2c   :  { %p125_p6 = pnand %p124_p5, %p118_p2 }
  0x2d   :  { %v50_v9 = vmul.f32 %v43_v7, %v36_v4  ;;  %v51_v10 = vmul.f32 %v47_v8, %v37_v6 }
  0x2f   :  { %52 = vst [vmem:[#allocation7] sm:$0xff] %v50_v9  ;;  %53 = vst [vmem:[#allocation7 + $0x8] sm:$0xff] %v51_v10 }
  0x30   :  { %128 = shalt.err (!%p125_p6)
}
  0x31   :  { %s129_s8 = scalar_lea.hbm %s201_s2, 256 }
  0x32   :  { %p130_p7 = scmp.ne.s32.totalorder %s201_s2, %s129_s8  ;;  %p133_p8 = scmp.lt.u32.totalorder %s129_s8, %s201_s2 }
  0x34   :  { %p135_p9 = pnand %p133_p8, %p130_p7 }
  0x36   :  { %138 = shalt.err (!%p135_p9)
}
  0x37   :  { %63 = dma.vmem_to_hbm [thread:$0]  %s61_s5, 256, %s201_s2, [#allocation4]  }
  0x38   :  { %143 = dma.done.wait [#allocation4], 256  }
  0x39   :  { %144 = vsyncadd [#allocation4], 4294967040 }
  0x3a   :  { %67 = vsyncpa [#allocation3], 1 }
  0x3b   :  { %68 = vsyncpa [#allocation6], 1 }
  0x3c   :  { %69 = vsyncpa [#allocation4], 1 }

</bundles_post_ra>
